<compile_context>
chip_gen: v7x
topology: tpu7x:2x2x1
jax: 0.10.0
libtpu: 0.0.40
codegen_flags: <defaults>
</compile_context>

<pallas_src>
import functools

import jax
import jax.numpy as jnp
from jax.experimental import pallas as pl
from jax.experimental.pallas import tpu as pltpu

PENALTY_WEIGHT = 0.45
PRICE_RANGES = (
    (0.0, 15000.0, 2.0),
    (15000.0, 20000.0, 2.5),
    (20000.0, 40000.0, 2.5),
    (40000.0, float("inf"), 3.5),
)

_LANES = 128
_ACC_ROWS = 16
# Accumulator row layout (per core; lane-partial sums, reduced in the wrapper):
#   0      : sum (pred - target)^2                   (base MSE numerator)
#   1, 2   : urban (target > 35): sum(penalty^2), count
#   3..8   : price ranges 0..2: (sum(rel^2), count) each
#   9      : unmasked sum(rel^2)                     (range 3 derived in wrapper)
#   10, 11 : underestimate (pred < 0.95*target): sum(rel^2), count
#   12, 13 : large-area (area > 800): sum(rel^2), count   (only if area given)
#   14, 15 : unused (pad the tile to (16, 128))


def _loss_kernel(*refs, has_area, step_axis):
    if has_area:
        pred_ref, target_ref, area_ref, out_ref = refs
    else:
        pred_ref, target_ref, out_ref = refs
        area_ref = None

    i = pl.program_id(step_axis)

    @pl.when(i == 0)
    def _init():
        out_ref[...] = jnp.zeros_like(out_ref)

    pred = pred_ref[...]
    target = target_ref[...]

    diff = pred - target
    sq_err = diff * diff
    # EUP reciprocal instead of a VALU divide; abs folded away since rel is
    # only ever used squared: rel^2 = diff^2 / target^2.
    r = pl.reciprocal(target, approx=True)
    rel_sq = sq_err * (r * r)

    # urban penalty: (rel*3)^2 if underestimating else (rel*1.5)^2
    urban_m = target > 35.0
    urban_sq = rel_sq * jnp.where(pred < target, 9.0, 2.25)

    # price-range masks from 3 comparisons (prices assumed nonnegative, so
    # range 0 is simply target < 15000; range 3 is derived in the wrapper)
    ge_15k = target >= 15000.0
    ge_20k = target >= 20000.0
    ge_40k = target >= 40000.0
    r0 = jnp.logical_not(ge_15k)
    r1 = ge_15k & jnp.logical_not(ge_20k)
    r2 = ge_20k & jnp.logical_not(ge_40k)
    under_m = pred < target * 0.95

    terms = [
        sq_err,                                                     # row 0
        jnp.where(urban_m, urban_sq, 0.0), jnp.where(urban_m, 1.0, 0.0),
        jnp.where(r0, rel_sq, 0.0), jnp.where(r0, 1.0, 0.0),
        jnp.where(r1, rel_sq, 0.0), jnp.where(r1, 1.0, 0.0),
        jnp.where(r2, rel_sq, 0.0), jnp.where(r2, 1.0, 0.0),
        rel_sq,                                                     # row 9
        jnp.where(under_m, rel_sq, 0.0), jnp.where(under_m, 1.0, 0.0),
    ]
    if has_area:
        area_m = area_ref[...] > 800.0
        terms += [jnp.where(area_m, rel_sq, 0.0), jnp.where(area_m, 1.0, 0.0)]

    # One sublane reduction per statistic; tiny per-row RMWs into the resident
    # output tile (replaces the old iota/compare/select packing chain).
    for k, t in enumerate(terms):
        out_ref[k:k + 1, :] += jnp.sum(t, axis=0, keepdims=True)


def _chip_config():
    """Return (num_cores, default block_rows) for the local TPU generation."""
    try:
        kind = jax.devices()[0].device_kind.lower()
    except Exception:
        kind = ""
    is_v5e = ("v5e" in kind) or ("v5 lite" in kind) or ("v5lite" in kind)
    is_v5p = ("v5p" in kind) or (("v5" in kind) and not is_v5e)
    is_v4 = "v4" in kind
    is_v6 = "v6" in kind
    is_v7 = ("v7" in kind) or ("tpu7" in kind) or ("7x" in kind)
    num_cores = 2 if (is_v4 or is_v5p or is_v7) else 1   # 2-TC / megacore chips
    if is_v4 or is_v5p or is_v6 or is_v7:
        block_rows = 8192   # 4 MiB/input/buffer; 24 MiB double-buffered < 32 MiB scoped
    elif is_v5e:
        block_rows = 4096   # 12 MiB double-buffered < v5e's 16 MiB scoped VMEM
    else:
        block_rows = 2048   # unknown / older chip: stay conservative
    return num_cores, block_rows


def _jnp_stats(pred, target, area, has_area):
    """Length-_ACC_ROWS statistics vector for a small remainder (plain JAX)."""
    diff = pred - target
    sq_err = diff * diff
    rel_sq = sq_err / (target * target)
    urban_m = target > 35.0
    urban_sq = rel_sq * jnp.where(pred < target, 9.0, 2.25)
    ge_15k = target >= 15000.0
    ge_20k = target >= 20000.0
    ge_40k = target >= 40000.0
    r0 = jnp.logical_not(ge_15k)
    r1 = ge_15k & jnp.logical_not(ge_20k)
    r2 = ge_20k & jnp.logical_not(ge_40k)
    under_m = pred < target * 0.95

    def msum(x, m):
        return jnp.sum(jnp.where(m, x, 0.0))

    def mcnt(m):
        return jnp.sum(m.astype(jnp.float32))

    vals = [jnp.sum(sq_err),
            msum(urban_sq, urban_m), mcnt(urban_m),
            msum(rel_sq, r0), mcnt(r0),
            msum(rel_sq, r1), mcnt(r1),
            msum(rel_sq, r2), mcnt(r2),
            jnp.sum(rel_sq),
            msum(rel_sq, under_m), mcnt(under_m)]
    if has_area:
        area_m = area > 800.0
        vals += [msum(rel_sq, area_m), mcnt(area_m)]
    while len(vals) < _ACC_ROWS:
        vals.append(jnp.zeros((), jnp.float32))
    return jnp.stack(vals).astype(jnp.float32)


def pallas_loss(pred, target, area=None, *, block_rows=None, num_cores=None):
    pred = jnp.ravel(pred).astype(jnp.float32)
    target = jnp.ravel(target).astype(jnp.float32)
    has_area = area is not None
    if has_area:
        area = jnp.ravel(area).astype(jnp.float32)

    n = pred.shape[0]
    lanes = _LANES

    det_cores, det_rows = _chip_config()
    if num_cores is None:
        num_cores = det_cores
    if block_rows is None:
        block_rows = det_rows

    # Block-aligned prefix for the kernel (no pad copy, no in-kernel validity
    # mask); the small remainder is reduced in plain JAX below.
    rows_avail = n // lanes
    nc = max(1, num_cores)
    if rows_avail < 8 * nc:
        nc = 1
    if rows_avail >= 8:
        per_core = rows_avail // nc
        brows = min(block_rows, (per_core // 8) * 8)
        steps = per_core // brows
        rows_main = nc * steps * brows
    else:
        brows = steps = rows_main = 0

    n_main = rows_main * lanes
    tot = jnp.zeros((_ACC_ROWS,), jnp.float32)

    if rows_main > 0:
        def head(x):
            return x[:n_main].reshape(rows_main, lanes)

        inputs = [head(pred), head(target)]
        if has_area:
            inputs.append(head(area))
        n_in = len(inputs)

        if nc > 1:
            grid = (nc, steps)
            in_spec = pl.BlockSpec((brows, lanes), lambda c, i: (c * steps + i, 0))
            out_spec = pl.BlockSpec((_ACC_ROWS, lanes), lambda c, i: (c, 0))
            step_axis = 1
        else:
            grid = (steps,)
            in_spec = pl.BlockSpec((brows, lanes), lambda i: (i, 0))
            out_spec = pl.BlockSpec((_ACC_ROWS, lanes), lambda i: (0, 0))
            step_axis = 0

        kernel = functools.partial(_loss_kernel, has_area=has_area,
                                   step_axis=step_axis)
        cost = pl.CostEstimate(
            flops=(30 if has_area else 26) * n_main,
            transcendentals=n_main,
            bytes_accessed=n_in * n_main * 4 + nc * _ACC_ROWS * lanes * 4)

        def run(dim_sems):
            return pl.pallas_call(
                kernel,
                out_shape=jax.ShapeDtypeStruct((nc * _ACC_ROWS, lanes),
                                               jnp.float32),
                grid_spec=pltpu.PrefetchScalarGridSpec(
                    num_scalar_prefetch=0,
                    grid=grid,
                    in_specs=[in_spec] * n_in,
                    out_specs=out_spec),
                compiler_params=pltpu.CompilerParams(
                    dimension_semantics=dim_sems),
                cost_estimate=cost,
            )(*inputs)

        acc = None
        if nc > 1:
            core_par = getattr(pltpu, "CORE_PARALLEL", None)
            arb = getattr(pltpu, "ARBITRARY", None)
            if core_par is not None and arb is not None:
                try:   # explicit 2-TC split (v7x / megacore); fall back if rejected
                    acc = jax.block_until_ready(run((core_par, arb)))
                except Exception:
                    acc = None
            if acc is None:
                acc = run(("parallel", "arbitrary"))
        else:
            acc = run(("arbitrary",))

        tot = acc.reshape(nc, _ACC_ROWS, lanes).sum(axis=(0, 2))

    if n_main < n:   # ragged remainder (< one block per core): plain JAX
        tail_area = area[n_main:] if has_area else None
        tot = tot + _jnp_stats(pred[n_main:], target[n_main:], tail_area,
                               has_area)

    # ---- tiny finalize in plain JAX ----
    def masked_mean(s, cnt):
        # torch: `if not torch.any(mask): return 0`
        return jnp.where(cnt > 0.5, s / jnp.maximum(cnt, 1.0), 0.0)

    total = tot[0] / jnp.float32(n)                                   # base MSE
    total = total + masked_mean(tot[1], tot[2]) * PENALTY_WEIGHT      # urban
    # price ranges; range 3 derived from unmasked totals (prices >= 0)
    s0, c0, s1, c1, s2, c2 = tot[3], tot[4], tot[5], tot[6], tot[7], tot[8]
    s3 = tot[9] - s0 - s1 - s2
    c3 = jnp.float32(n) - c0 - c1 - c2
    for (s, c), (_lo, _hi, w) in zip(((s0, c0), (s1, c1), (s2, c2), (s3, c3)),
                                     PRICE_RANGES):
        total = total + masked_mean(s, c) * PENALTY_WEIGHT * w
    total = total + masked_mean(tot[10], tot[11]) * PENALTY_WEIGHT * 3.5
    if has_area:
        total = total + masked_mean(tot[12], tot[13]) * PENALTY_WEIGHT * 1.5
    return total


def reference_loss(pred, target, area=None):
    """Pure-JAX reference mirroring the PyTorch forward."""
    pred = jnp.ravel(pred).astype(jnp.float32)
    target = jnp.ravel(target).astype(jnp.float32)
    base = jnp.mean((pred - target) ** 2)
    rel = jnp.abs(pred - target) / target

    def masked_mean(x, m):
        c = jnp.sum(m.astype(jnp.float32))
        s = jnp.sum(jnp.where(m, x, 0.0))
        return jnp.where(c > 0.0, s / jnp.maximum(c, 1.0), 0.0)

    urban_m = target > 35.0
    pen = jnp.where(pred < target, rel * 3.0, rel * 1.5)
    urban_loss = masked_mean(pen * pen, urban_m) * PENALTY_WEIGHT

    range_loss = 0.0
    for lo, hi, w in PRICE_RANGES:
        m = (target >= lo) & (target < hi)
        range_loss = range_loss + masked_mean(rel * rel, m) * PENALTY_WEIGHT * w

    under_loss = masked_mean(rel * rel, pred < target * 0.95) * PENALTY_WEIGHT * 3.5

    area_loss = 0.0
    if area is not None:
        area = jnp.ravel(area).astype(jnp.float32)
        area_loss = masked_mean(rel * rel, area > 800.0) * PENALTY_WEIGHT * 1.5

    return base + urban_loss + range_loss + under_loss + area_loss


def _check(pred, target, area, tag):
    loss = jax.block_until_ready(pallas_loss(pred, target, area))
    ref = reference_loss(pred, target, area)
    rel_err = abs(float(loss) - float(ref)) / max(1.0, abs(float(ref)))
    assert rel_err < 1e-3, (
        f"{tag} mismatch: pallas={float(loss)} ref={float(ref)} rel={rel_err}")


if __name__ == "__main__":
    key = jax.random.PRNGKey(0)
    k1, k2, k3 = jax.random.split(key, 3)

    # Case 1: lane-aligned batch (kernel covers everything), with area.
    n1 = 2048
    target1 = jax.random.uniform(k1, (n1, 1), minval=10.0, maxval=50000.0,
                                 dtype=jnp.float32)
    noise1 = jax.random.normal(k2, (n1, 1), dtype=jnp.float32) * 0.1
    pred1 = target1 * (1.0 + noise1)
    area1 = jax.random.uniform(k3, (n1, 1), minval=100.0, maxval=1200.0,
                               dtype=jnp.float32)
    _check(pred1, target1, area1, "case1")

    # Case 2: ragged batch (kernel prefix + plain-JAX tail) and area=None
    # (exercises the 2-input kernel variant).
    n2 = 2000
    _check(pred1[:n2], target1[:n2], None, "case2")

    print("KERNEL_OK")
</pallas_src>

<mosaic_0001>
module attributes {stable_mosaic.version = 11 : i64} {
  func.func @_loss_kernel(%arg0: i32, %arg1: memref<16x128xf32, #tpu.memory_space<vmem>>, %arg2: memref<16x128xf32, #tpu.memory_space<vmem>>, %arg3: memref<16x128xf32, #tpu.memory_space<vmem>>, %arg4: memref<16x128xf32, #tpu.memory_space<vmem>>) attributes {dimension_semantics = [#tpu.dimension_semantics<arbitrary>], iteration_bounds = array<i64: 1>, scalar_prefetch = 0 : i64, scratch_operands = 0 : i64, tpu.core_type = #tpu.core_type<tc>, window_params = [{transform_indices = @transform_0, window_bounds = array<i64: 16, 128>}, {transform_indices = @transform_1, window_bounds = array<i64: 16, 128>}, {transform_indices = @transform_2, window_bounds = array<i64: 16, 128>}, {pipeline_mode = #tpu.pipeline_mode<synchronous>, transform_indices = @transform_3, window_bounds = array<i64: 16, 128>}]} {
    %c0_i32 = arith.constant 0 : i32
    %0 = arith.cmpi eq, %arg0, %c0_i32 : i32
    %1 = arith.extui %0 : i1 to i32
    %c0_i32_0 = arith.constant 0 : i32
    %2 = arith.cmpi ne, %1, %c0_i32_0 : i32
    scf.if %2 {
      %cst_91 = arith.constant 0.000000e+00 : f32
      %134 = vector.broadcast %cst_91 : f32 to vector<16x128xf32>
      %c0_92 = arith.constant 0 : index
      %c0_93 = arith.constant 0 : index
      %135 = vector.load %arg4[%c0_92, %c0_93] : memref<16x128xf32, #tpu.memory_space<vmem>>, vector<16x128xf32>
      tpu.vector_store %arg4[%c0_92, %c0_93], %134 {strides = array<i32>} : memref<16x128xf32, #tpu.memory_space<vmem>>, vector<16x128xf32>,
    } else {
    }
    %c0 = arith.constant 0 : index
    %c0_1 = arith.constant 0 : index
    %3 = vector.load %arg1[%c0, %c0_1] : memref<16x128xf32, #tpu.memory_space<vmem>>, vector<16x128xf32>
    %c0_2 = arith.constant 0 : index
    %c0_3 = arith.constant 0 : index
    %4 = vector.load %arg2[%c0_2, %c0_3] : memref<16x128xf32, #tpu.memory_space<vmem>>, vector<16x128xf32>
    %5 = arith.subf %3, %4 : vector<16x128xf32>
    %6 = arith.mulf %5, %5 : vector<16x128xf32>
    %7 = tpu.reciprocal %4 {approx = true} : vector<16x128xf32> -> vector<16x128xf32>
    %8 = arith.mulf %7, %7 : vector<16x128xf32>
    %9 = arith.mulf %6, %8 : vector<16x128xf32>
    %cst = arith.constant 3.500000e+01 : f32
    %10 = vector.broadcast %cst : f32 to vector<16x128xf32>
    %11 = arith.cmpf ogt, %4, %10 : vector<16x128xf32>
    %12 = arith.cmpf olt, %3, %4 : vector<16x128xf32>
    %cst_4 = arith.constant 9.000000e+00 : f32
    %cst_5 = arith.constant 2.250000e+00 : f32
    %13 = vector.broadcast %cst_4 : f32 to vector<16x128xf32>
    %14 = vector.broadcast %cst_5 : f32 to vector<16x128xf32>
    %15 = arith.select %12, %13, %14 : vector<16x128xi1>, vector<16x128xf32>
    %16 = arith.mulf %9, %15 : vector<16x128xf32>
    %cst_6 = arith.constant 1.500000e+04 : f32
    %17 = vector.broadcast %cst_6 : f32 to vector<16x128xf32>
    %18 = arith.cmpf oge, %4, %17 : vector<16x128xf32>
    %cst_7 = arith.constant 2.000000e+04 : f32
    %19 = vector.broadcast %cst_7 : f32 to vector<16x128xf32>
    %20 = arith.cmpf oge, %4, %19 : vector<16x128xf32>
    %cst_8 = arith.constant 4.000000e+04 : f32
    %21 = vector.broadcast %cst_8 : f32 to vector<16x128xf32>
    %22 = arith.cmpf oge, %4, %21 : vector<16x128xf32>
    %cst_9 = arith.constant dense<true> : vector<16x128xi1>
    %23 = arith.xori %18, %cst_9 : vector<16x128xi1>
    %cst_10 = arith.constant dense<true> : vector<16x128xi1>
    %24 = arith.xori %20, %cst_10 : vector<16x128xi1>
    %25 = arith.andi %18, %24 : vector<16x128xi1>
    %cst_11 = arith.constant dense<true> : vector<16x128xi1>
    %26 = arith.xori %22, %cst_11 : vector<16x128xi1>
    %27 = arith.andi %20, %26 : vector<16x128xi1>
    %cst_12 = arith.constant 0.949999988 : f32
    %28 = vector.broadcast %cst_12 : f32 to vector<16x128xf32>
    %29 = arith.mulf %4, %28 : vector<16x128xf32>
    %30 = arith.cmpf olt, %3, %29 : vector<16x128xf32>
    %cst_13 = arith.constant 0.000000e+00 : f32
    %31 = vector.broadcast %cst_13 : f32 to vector<16x128xf32>
    %32 = arith.select %11, %16, %31 : vector<16x128xi1>, vector<16x128xf32>
    %cst_14 = arith.constant 1.000000e+00 : f32
    %cst_15 = arith.constant 0.000000e+00 : f32
    %33 = vector.broadcast %cst_14 : f32 to vector<16x128xf32>
    %34 = vector.broadcast %cst_15 : f32 to vector<16x128xf32>
    %35 = arith.select %11, %33, %34 : vector<16x128xi1>, vector<16x128xf32>
    %cst_16 = arith.constant 0.000000e+00 : f32
    %36 = vector.broadcast %cst_16 : f32 to vector<16x128xf32>
    %37 = arith.select %23, %9, %36 : vector<16x128xi1>, vector<16x128xf32>
    %cst_17 = arith.constant 1.000000e+00 : f32
    %cst_18 = arith.constant 0.000000e+00 : f32
    %38 = vector.broadcast %cst_17 : f32 to vector<16x128xf32>
    %39 = vector.broadcast %cst_18 : f32 to vector<16x128xf32>
    %40 = arith.select %23, %38, %39 : vector<16x128xi1>, vector<16x128xf32>
    %cst_19 = arith.constant 0.000000e+00 : f32
    %41 = vector.broadcast %cst_19 : f32 to vector<16x128xf32>
    %42 = arith.select %25, %9, %41 : vector<16x128xi1>, vector<16x128xf32>
    %cst_20 = arith.constant 1.000000e+00 : f32
    %cst_21 = arith.constant 0.000000e+00 : f32
    %43 = vector.broadcast %cst_20 : f32 to vector<16x128xf32>
    %44 = vector.broadcast %cst_21 : f32 to vector<16x128xf32>
    %45 = arith.select %25, %43, %44 : vector<16x128xi1>, vector<16x128xf32>
    %cst_22 = arith.constant 0.000000e+00 : f32
    %46 = vector.broadcast %cst_22 : f32 to vector<16x128xf32>
    %47 = arith.select %27, %9, %46 : vector<16x128xi1>, vector<16x128xf32>
    %cst_23 = arith.constant 1.000000e+00 : f32
    %cst_24 = arith.constant 0.000000e+00 : f32
    %48 = vector.broadcast %cst_23 : f32 to vector<16x128xf32>
    %49 = vector.broadcast %cst_24 : f32 to vector<16x128xf32>
    %50 = arith.select %27, %48, %49 : vector<16x128xi1>, vector<16x128xf32>
    %cst_25 = arith.constant 0.000000e+00 : f32
    %51 = vector.broadcast %cst_25 : f32 to vector<16x128xf32>
    %52 = arith.select %30, %9, %51 : vector<16x128xi1>, vector<16x128xf32>
    %cst_26 = arith.constant 1.000000e+00 : f32
    %cst_27 = arith.constant 0.000000e+00 : f32
    %53 = vector.broadcast %cst_26 : f32 to vector<16x128xf32>
    %54 = vector.broadcast %cst_27 : f32 to vector<16x128xf32>
    %55 = arith.select %30, %53, %54 : vector<16x128xi1>, vector<16x128xf32>
    %c0_28 = arith.constant 0 : index
    %c0_29 = arith.constant 0 : index
    %56 = vector.load %arg3[%c0_28, %c0_29] : memref<16x128xf32, #tpu.memory_space<vmem>>, vector<16x128xf32>
    %cst_30 = arith.constant 8.000000e+02 : f32
    %57 = vector.broadcast %cst_30 : f32 to vector<16x128xf32>
    %58 = arith.cmpf ogt, %56, %57 : vector<16x128xf32>
    %cst_31 = arith.constant 0.000000e+00 : f32
    %59 = vector.broadcast %cst_31 : f32 to vector<16x128xf32>
    %60 = arith.select %58, %9, %59 : vector<16x128xi1>, vector<16x128xf32>
    %cst_32 = arith.constant 1.000000e+00 : f32
    %cst_33 = arith.constant 0.000000e+00 : f32
    %61 = vector.broadcast %cst_32 : f32 to vector<16x128xf32>
    %62 = vector.broadcast %cst_33 : f32 to vector<16x128xf32>
    %63 = arith.select %58, %61, %62 : vector<16x128xi1>, vector<16x128xf32>
    %c0_34 = arith.constant 0 : index
    %c0_35 = arith.constant 0 : index
    %64 = vector.load %arg4[%c0_34, %c0_35] : memref<16x128xf32, #tpu.memory_space<vmem>>, vector<1x128xf32>
    %cst_36 = arith.constant dense<0.000000e+00> : vector<128xf32>
    %65 = vector.multi_reduction <add>, %6, %cst_36 [0] : vector<16x128xf32> to vector<128xf32>
    %66 = vector.shape_cast %65 : vector<128xf32> to vector<1x128xf32>
    %67 = arith.addf %64, %66 : vector<1x128xf32>
    %c0_37 = arith.constant 0 : index
    %c0_38 = arith.constant 0 : index
    %68 = vector.load %arg4[%c0_37, %c0_38] : memref<16x128xf32, #tpu.memory_space<vmem>>, vector<1x128xf32>
    tpu.vector_store %arg4[%c0_37, %c0_38], %67 {strides = array<i32>} : memref<16x128xf32, #tpu.memory_space<vmem>>, vector<1x128xf32>,
    %c1 = arith.constant 1 : index
    %c0_39 = arith.constant 0 : index
    %69 = vector.load %arg4[%c1, %c0_39] : memref<16x128xf32, #tpu.memory_space<vmem>>, vector<1x128xf32>
    %cst_40 = arith.constant dense<0.000000e+00> : vector<128xf32>
    %70 = vector.multi_reduction <add>, %32, %cst_40 [0] : vector<16x128xf32> to vector<128xf32>
    %71 = vector.shape_cast %70 : vector<128xf32> to vector<1x128xf32>
    %72 = arith.addf %69, %71 : vector<1x128xf32>
    %c1_41 = arith.constant 1 : index
    %c0_42 = arith.constant 0 : index
    %73 = vector.load %arg4[%c1_41, %c0_42] : memref<16x128xf32, #tpu.memory_space<vmem>>, vector<1x128xf32>
    tpu.vector_store %arg4[%c1_41, %c0_42], %72 {strides = array<i32>} : memref<16x128xf32, #tpu.memory_space<vmem>>, vector<1x128xf32>,
    %c2 = arith.constant 2 : index
    %c0_43 = arith.constant 0 : index
    %74 = vector.load %arg4[%c2, %c0_43] : memref<16x128xf32, #tpu.memory_space<vmem>>, vector<1x128xf32>
    %cst_44 = arith.constant dense<0.000000e+00> : vector<128xf32>
    %75 = vector.multi_reduction <add>, %35, %cst_44 [0] : vector<16x128xf32> to vector<128xf32>
    %76 = vector.shape_cast %75 : vector<128xf32> to vector<1x128xf32>
    %77 = arith.addf %74, %76 : vector<1x128xf32>
    %c2_45 = arith.constant 2 : index
    %c0_46 = arith.constant 0 : index
    %78 = vector.load %arg4[%c2_45, %c0_46] : memref<16x128xf32, #tpu.memory_space<vmem>>, vector<1x128xf32>
    tpu.vector_store %arg4[%c2_45, %c0_46], %77 {strides = array<i32>} : memref<16x128xf32, #tpu.memory_space<vmem>>, vector<1x128xf32>,
    %c3 = arith.constant 3 : index
    %c0_47 = arith.constant 0 : index
    %79 = vector.load %arg4[%c3, %c0_47] : memref<16x128xf32, #tpu.memory_space<vmem>>, vector<1x128xf32>
    %cst_48 = arith.constant dense<0.000000e+00> : vector<128xf32>
    %80 = vector.multi_reduction <add>, %37, %cst_48 [0] : vector<16x128xf32> to vector<128xf32>
    %81 = vector.shape_cast %80 : vector<128xf32> to vector<1x128xf32>
    %82 = arith.addf %79, %81 : vector<1x128xf32>
    %c3_49 = arith.constant 3 : index
    %c0_50 = arith.constant 0 : index
    %83 = vector.load %arg4[%c3_49, %c0_50] : memref<16x128xf32, #tpu.memory_space<vmem>>, vector<1x128xf32>
    tpu.vector_store %arg4[%c3_49, %c0_50], %82 {strides = array<i32>} : memref<16x128xf32, #tpu.memory_space<vmem>>, vector<1x128xf32>,
    %c4 = arith.constant 4 : index
    %c0_51 = arith.constant 0 : index
    %84 = vector.load %arg4[%c4, %c0_51] : memref<16x128xf32, #tpu.memory_space<vmem>>, vector<1x128xf32>
    %cst_52 = arith.constant dense<0.000000e+00> : vector<128xf32>
    %85 = vector.multi_reduction <add>, %40, %cst_52 [0] : vector<16x128xf32> to vector<128xf32>
    %86 = vector.shape_cast %85 : vector<128xf32> to vector<1x128xf32>
    %87 = arith.addf %84, %86 : vector<1x128xf32>
    %c4_53 = arith.constant 4 : index
    %c0_54 = arith.constant 0 : index
    %88 = vector.load %arg4[%c4_53, %c0_54] : memref<16x128xf32, #tpu.memory_space<vmem>>, vector<1x128xf32>
    tpu.vector_store %arg4[%c4_53, %c0_54], %87 {strides = array<i32>} : memref<16x128xf32, #tpu.memory_space<vmem>>, vector<1x128xf32>,
    %c5 = arith.constant 5 : index
    %c0_55 = arith.constant 0 : index
    %89 = vector.load %arg4[%c5, %c0_55] : memref<16x128xf32, #tpu.memory_space<vmem>>, vector<1x128xf32>
    %cst_56 = arith.constant dense<0.000000e+00> : vector<128xf32>
    %90 = vector.multi_reduction <add>, %42, %cst_56 [0] : vector<16x128xf32> to vector<128xf32>
    %91 = vector.shape_cast %90 : vector<128xf32> to vector<1x128xf32>
    %92 = arith.addf %89, %91 : vector<1x128xf32>
    %c5_57 = arith.constant 5 : index
    %c0_58 = arith.constant 0 : index
    %93 = vector.load %arg4[%c5_57, %c0_58] : memref<16x128xf32, #tpu.memory_space<vmem>>, vector<1x128xf32>
    tpu.vector_store %arg4[%c5_57, %c0_58], %92 {strides = array<i32>} : memref<16x128xf32, #tpu.memory_space<vmem>>, vector<1x128xf32>,
    %c6 = arith.constant 6 : index
    %c0_59 = arith.constant 0 : index
    %94 = vector.load %arg4[%c6, %c0_59] : memref<16x128xf32, #tpu.memory_space<vmem>>, vector<1x128xf32>
    %cst_60 = arith.constant dense<0.000000e+00> : vector<128xf32>
    %95 = vector.multi_reduction <add>, %45, %cst_60 [0] : vector<16x128xf32> to vector<128xf32>
    %96 = vector.shape_cast %95 : vector<128xf32> to vector<1x128xf32>
    %97 = arith.addf %94, %96 : vector<1x128xf32>
    %c6_61 = arith.constant 6 : index
    %c0_62 = arith.constant 0 : index
    %98 = vector.load %arg4[%c6_61, %c0_62] : memref<16x128xf32, #tpu.memory_space<vmem>>, vector<1x128xf32>
    tpu.vector_store %arg4[%c6_61, %c0_62], %97 {strides = array<i32>} : memref<16x128xf32, #tpu.memory_space<vmem>>, vector<1x128xf32>,
    %c7 = arith.constant 7 : index
    %c0_63 = arith.constant 0 : index
    %99 = vector.load %arg4[%c7, %c0_63] : memref<16x128xf32, #tpu.memory_space<vmem>>, vector<1x128xf32>
    %cst_64 = arith.constant dense<0.000000e+00> : vector<128xf32>
    %100 = vector.multi_reduction <add>, %47, %cst_64 [0] : vector<16x128xf32> to vector<128xf32>
    %101 = vector.shape_cast %100 : vector<128xf32> to vector<1x128xf32>
    %102 = arith.addf %99, %101 : vector<1x128xf32>
    %c7_65 = arith.constant 7 : index
    %c0_66 = arith.constant 0 : index
    %103 = vector.load %arg4[%c7_65, %c0_66] : memref<16x128xf32, #tpu.memory_space<vmem>>, vector<1x128xf32>
    tpu.vector_store %arg4[%c7_65, %c0_66], %102 {strides = array<i32>} : memref<16x128xf32, #tpu.memory_space<vmem>>, vector<1x128xf32>,
    %c8 = arith.constant 8 : index
    %c0_67 = arith.constant 0 : index
    %104 = vector.load %arg4[%c8, %c0_67] : memref<16x128xf32, #tpu.memory_space<vmem>>, vector<1x128xf32>
    %cst_68 = arith.constant dense<0.000000e+00> : vector<128xf32>
    %105 = vector.multi_reduction <add>, %50, %cst_68 [0] : vector<16x128xf32> to vector<128xf32>
    %106 = vector.shape_cast %105 : vector<128xf32> to vector<1x128xf32>
    %107 = arith.addf %104, %106 : vector<1x128xf32>
    %c8_69 = arith.constant 8 : index
    %c0_70 = arith.constant 0 : index
    %108 = vector.load %arg4[%c8_69, %c0_70] : memref<16x128xf32, #tpu.memory_space<vmem>>, vector<1x128xf32>
    tpu.vector_store %arg4[%c8_69, %c0_70], %107 {strides = array<i32>} : memref<16x128xf32, #tpu.memory_space<vmem>>, vector<1x128xf32>,
    %c9 = arith.constant 9 : index
    %c0_71 = arith.constant 0 : index
    %109 = vector.load %arg4[%c9, %c0_71] : memref<16x128xf32, #tpu.memory_space<vmem>>, vector<1x128xf32>
    %cst_72 = arith.constant dense<0.000000e+00> : vector<128xf32>
    %110 = vector.multi_reduction <add>, %9, %cst_72 [0] : vector<16x128xf32> to vector<128xf32>
    %111 = vector.shape_cast %110 : vector<128xf32> to vector<1x128xf32>
    %112 = arith.addf %109, %111 : vector<1x128xf32>
    %c9_73 = arith.constant 9 : index
    %c0_74 = arith.constant 0 : index
    %113 = vector.load %arg4[%c9_73, %c0_74] : memref<16x128xf32, #tpu.memory_space<vmem>>, vector<1x128xf32>
    tpu.vector_store %arg4[%c9_73, %c0_74], %112 {strides = array<i32>} : memref<16x128xf32, #tpu.memory_space<vmem>>, vector<1x128xf32>,
    %c10 = arith.constant 10 : index
    %c0_75 = arith.constant 0 : index
    %114 = vector.load %arg4[%c10, %c0_75] : memref<16x128xf32, #tpu.memory_space<vmem>>, vector<1x128xf32>
    %cst_76 = arith.constant dense<0.000000e+00> : vector<128xf32>
    %115 = vector.multi_reduction <add>, %52, %cst_76 [0] : vector<16x128xf32> to vector<128xf32>
    %116 = vector.shape_cast %115 : vector<128xf32> to vector<1x128xf32>
    %117 = arith.addf %114, %116 : vector<1x128xf32>
    %c10_77 = arith.constant 10 : index
    %c0_78 = arith.constant 0 : index
    %118 = vector.load %arg4[%c10_77, %c0_78] : memref<16x128xf32, #tpu.memory_space<vmem>>, vector<1x128xf32>
    tpu.vector_store %arg4[%c10_77, %c0_78], %117 {strides = array<i32>} : memref<16x128xf32, #tpu.memory_space<vmem>>, vector<1x128xf32>,
    %c11 = arith.constant 11 : index
    %c0_79 = arith.constant 0 : index
    %119 = vector.load %arg4[%c11, %c0_79] : memref<16x128xf32, #tpu.memory_space<vmem>>, vector<1x128xf32>
    %cst_80 = arith.constant dense<0.000000e+00> : vector<128xf32>
    %120 = vector.multi_reduction <add>, %55, %cst_80 [0] : vector<16x128xf32> to vector<128xf32>
    %121 = vector.shape_cast %120 : vector<128xf32> to vector<1x128xf32>
    %122 = arith.addf %119, %121 : vector<1x128xf32>
    %c11_81 = arith.constant 11 : index
    %c0_82 = arith.constant 0 : index
    %123 = vector.load %arg4[%c11_81, %c0_82] : memref<16x128xf32, #tpu.memory_space<vmem>>, vector<1x128xf32>
    tpu.vector_store %arg4[%c11_81, %c0_82], %122 {strides = array<i32>} : memref<16x128xf32, #tpu.memory_space<vmem>>, vector<1x128xf32>,
    %c12 = arith.constant 12 : index
    %c0_83 = arith.constant 0 : index
    %124 = vector.load %arg4[%c12, %c0_83] : memref<16x128xf32, #tpu.memory_space<vmem>>, vector<1x128xf32>
    %cst_84 = arith.constant dense<0.000000e+00> : vector<128xf32>
    %125 = vector.multi_reduction <add>, %60, %cst_84 [0] : vector<16x128xf32> to vector<128xf32>
    %126 = vector.shape_cast %125 : vector<128xf32> to vector<1x128xf32>
    %127 = arith.addf %124, %126 : vector<1x128xf32>
    %c12_85 = arith.constant 12 : index
    %c0_86 = arith.constant 0 : index
    %128 = vector.load %arg4[%c12_85, %c0_86] : memref<16x128xf32, #tpu.memory_space<vmem>>, vector<1x128xf32>
    tpu.vector_store %arg4[%c12_85, %c0_86], %127 {strides = array<i32>} : memref<16x128xf32, #tpu.memory_space<vmem>>, vector<1x128xf32>,
    %c13 = arith.constant 13 : index
    %c0_87 = arith.constant 0 : index
    %129 = vector.load %arg4[%c13, %c0_87] : memref<16x128xf32, #tpu.memory_space<vmem>>, vector<1x128xf32>
    %cst_88 = arith.constant dense<0.000000e+00> : vector<128xf32>
    %130 = vector.multi_reduction <add>, %63, %cst_88 [0] : vector<16x128xf32> to vector<128xf32>
    %131 = vector.shape_cast %130 : vector<128xf32> to vector<1x128xf32>
    %132 = arith.addf %129, %131 : vector<1x128xf32>
    %c13_89 = arith.constant 13 : index
    %c0_90 = arith.constant 0 : index
    %133 = vector.load %arg4[%c13_89, %c0_90] : memref<16x128xf32, #tpu.memory_space<vmem>>, vector<1x128xf32>
    tpu.vector_store %arg4[%c13_89, %c0_90], %132 {strides = array<i32>} : memref<16x128xf32, #tpu.memory_space<vmem>>, vector<1x128xf32>,
    return
  }
  func.func @transform_0(%arg0: i32) -> (i32, i32) {
    %c0_i32 = arith.constant 0 : i32
    %c0_i32_0 = arith.constant 0 : i32
    return %arg0, %c0_i32 : i32, i32
  }
  func.func @transform_1(%arg0: i32) -> (i32, i32) {
    %c0_i32 = arith.constant 0 : i32
    %c0_i32_0 = arith.constant 0 : i32
    return %arg0, %c0_i32 : i32, i32
  }
  func.func @transform_2(%arg0: i32) -> (i32, i32) {
    %c0_i32 = arith.constant 0 : i32
    %c0_i32_0 = arith.constant 0 : i32
    return %arg0, %c0_i32 : i32, i32
  }
  func.func @transform_3(%arg0: i32) -> (i32, i32) {
    %c0_i32 = arith.constant 0 : i32
    %c0_i32_0 = arith.constant 0 : i32
    %c0_i32_1 = arith.constant 0 : i32
    return %c0_i32, %c0_i32_0 : i32, i32
  }
}

</mosaic_0001>

<bundles_post_ra>
// kernel: tpu_custom_call.1
= control target key start
LH: loop header
LB: loop body
LE: loop exit
PB: predicated region body
PF: predicated region fallthrough
CT: control target
= control target key end

     0   :  { %8 = vsyncpa [#allocation3], 0  ;;  %s679_s0 = inlined_call_operand.hbm [shape: f32[16,128], index: 0, kind: input, shape index: {}]   ;;  %s680_s1 = inlined_call_operand.hbm [shape: f32[16,128], index: 1, kind: input, shape index: {}]   ;;  %s681_s2 = inlined_call_operand.hbm [shape: f32[16,128], index: 2, kind: input, shape index: {}]   ;;  %s682_s3 = inlined_call_operand.hbm [shape: f32[16,128], index: 3, kind: output, shape index: {}]  }
   0x1   :  { %9 = vsyncpa [#allocation6], 0 }
   0x2   :  { %10 = vsyncpa [#allocation4], 0  ;;  %s397_s12 = smov [#allocation5]   ;;  %s398_s14 = smov [#allocation2]  }
   0x3   :  { %s28_s13 = sshll.u32 %s397_s12, 4  ;;  %s16_s15 = sshll.u32 %s398_s14, 4  ;;  %s29_s13 = int_to_ptr.vmem [resolvable:$true] %s28_s13  ;;  %s426_s15 = int_to_ptr.vmem [resolvable:$true] %s16_s15 }
   0x4   :  { %s303_s18 = scalar_lea.hbm %s680_s1, 256 }
   0x5   :  { %p304_p0 = scmp.ne.s32.totalorder %s680_s1, %s303_s18  ;;  %p307_p1 = scmp.lt.u32.totalorder %s303_s18, %s680_s1 }
   0x7   :  { %p309_p2 = pnand %p307_p1, %p304_p0 }
   0x9   :  { %312 = shalt.err (!%p309_p2)
}
   0xa   :  { %s313_s23 = scalar_lea.vmem %s29_s13, 256  ;;  %p318_p4 = scmp.lt.s32.totalorder %s29_s13, %s29_s13 }
   0xb   :  { %p314_p3 = scmp.ne.s32.totalorder %s29_s13, %s313_s23  ;;  %p319_p5 = scmp.lt.s32.totalorder %s313_s23, %s313_s23 }
   0xd   :  { %p320_p6 = por %p319_p5, %p318_p4 }
   0xf   :  { %p321_p7 = pnand %p320_p6, %p314_p3 }
  0x11   :  { %324 = shalt.err (!%p321_p7)
}
  0x12   :  { %s399_s24 = smov 128   ;;  %s400_s25 = smov 8  }
  0x13   :  { %34 = dma.hbm_to_vmem [thread:$0]  %s680_s1, 256, %s29_s13, [#allocation6], %s399_s24, %s399_s24, %s400_s25  }
  0x14   :  { %s325_s30 = scalar_lea.hbm %s679_s0, 256 }
  0x15   :  { %p326_p8 = scmp.ne.s32.totalorder %s679_s0, %s325_s30  ;;  %p329_p9 = scmp.lt.u32.totalorder %s325_s30, %s679_s0 }
  0x17   :  { %p331_p10 = pnand %p329_p9, %p326_p8 }
  0x19   :  { %334 = shalt.err (!%p331_p10)
}
  0x1a   :  { %s335_s8 = scalar_lea.vmem %s426_s15, 256  ;;  %p340_p12 = scmp.lt.s32.totalorder %s426_s15, %s426_s15 }
  0x1b   :  { %p336_p11 = scmp.ne.s32.totalorder %s426_s15, %s335_s8  ;;  %p341_p13 = scmp.lt.s32.totalorder %s335_s8, %s335_s8 }
  0x1d   :  { %p342_p0 = por %p341_p13, %p340_p12 }
  0x1f   :  { %p343_p1 = pnand %p342_p0, %p336_p11 }
  0x21   :  { %346 = shalt.err (!%p343_p1)
}
  0x22   :  { %22 = dma.hbm_to_vmem [thread:$0]  %s679_s0, 256, %s426_s15, [#allocation3], %s399_s24, %s399_s24, %s400_s25  }
  0x23   :  { %s401_s10 = smov [#allocation7]   ;;  %s347_s14 = scalar_lea.hbm %s681_s2, 256 }
  0x24   :  { %s40_s11 = sshll.u32 %s401_s10, 4  ;;  %p348_p2 = scmp.ne.s32.totalorder %s681_s2, %s347_s14  ;;  %s41_s11 = int_to_ptr.vmem [resolvable:$true] %s40_s11 }
  0x25   :  { %p351_p3 = scmp.lt.u32.totalorder %s347_s14, %s681_s2 }
  0x27   :  { %p353_p4 = pnand %p351_p3, %p348_p2 }
  0x29   :  { %356 = shalt.err (!%p353_p4)
}
  0x2a   :  { %s357_s20 = scalar_lea.vmem %s41_s11, 256  ;;  %p362_p6 = scmp.lt.s32.totalorder %s41_s11, %s41_s11 }
  0x2b   :  { %p358_p5 = scmp.ne.s32.totalorder %s41_s11, %s357_s20  ;;  %p363_p7 = scmp.lt.s32.totalorder %s357_s20, %s357_s20 }
  0x2d   :  { %p364_p8 = por %p363_p7, %p362_p6 }
  0x2f   :  { %p365_p9 = pnand %p364_p8, %p358_p5 }
  0x31   :  { %368 = shalt.err (!%p365_p9)
}
  0x32   :  { %46 = dma.hbm_to_vmem [thread:$0]  %s681_s2, 256, %s41_s11, [#allocation6], %s399_s24, %s399_s24, %s400_s25  }
  0x33   :  { %391 = dma.done.wait [#allocation3], 256  }
  0x34   :  { %392 = vsyncadd [#allocation3], 4294967040 }
  0x35   :  { %393 = dma.done.wait [#allocation6], 512  }
  0x36   :  { %394 = vsyncadd [#allocation6], 4294966784  ;;  %v402_v0 = vmov 0.0   ;;  %v480_v1 = vld [vmem:[#allocation2] sm:$0xff]  ;;  %v482_v2 = vld [vmem:[#allocation2 + $0x8] sm:$0xff]  ;;  %v403_v11 = vmov 2.25  }
  0x37   :  { %60 = vst [vmem:[#allocation8] sm:$0xff] %v402_v0  ;;  %61 = vst [vmem:[#allocation8 + $0x8] sm:$0xff] %v402_v0  ;;  %v484_v3 = vld [vmem:[#allocation5] sm:$0xff]  ;;  %v486_v4 = vld [vmem:[#allocation5 + $0x8] sm:$0xff]  ;;  %vm404_vm6 = vmmov 1   ;;  %s405_s2 = smov [#allocation8]  }
  0x38   :  { %v66_v5 = vsub.f32 %v480_v1, %v484_v3  ;;  %299 = vrcp.f32 %v484_v3  ;;  %vm684_vm0 = vcmp.gt.f32.partialorder %v484_v3, 35.0  ;;  %v67_v6 = vsub.f32 %v482_v2, %v486_v4  ;;  %v517_v15 = vld [vmem:[#allocation7] sm:$0xff]  ;;  %v530_v20 = vld [vmem:[#allocation7 + $0x8] sm:$0xff]  ;;  %s277_s21 = sshll.u32 %s405_s2, 4  ;;  %s278_s21 = int_to_ptr.vmem [resolvable:$true] %s277_s21 }
  0x39   :  { %301 = vrcp.f32 %v486_v4  ;;  %vm683_vm1 = vcmp.gt.f32.partialorder %v486_v4, 35.0  ;;  %vm78_vm2 = vcmp.lt.f32.partialorder %v480_v1, %v484_v3  ;;  %vm79_vm3 = vcmp.lt.f32.partialorder %v482_v2, %v486_v4  ;;  %s369_s22 = scalar_lea.vmem %s278_s21, 256  ;;  %p374_p11 = scmp.lt.s32.totalorder %s278_s21, %s278_s21 }
  0x3a   :  { %v68_v7 = vmul.f32 %v66_v5, %v66_v5  ;;  %v106_v8 = vsel %vm684_vm0, 1.0, %v402_v0  ;;  %v69_v9 = vmul.f32 %v67_v6, %v67_v6  ;;  %v107_v10 = vsel %vm683_vm1, 1.0, %v402_v0  ;;  %p370_p10 = scmp.ne.s32.totalorder %s278_s21, %s369_s22  ;;  %p375_p12 = scmp.lt.s32.totalorder %s369_s22, %s369_s22 }
  0x3b   :  { %vm84_vm4 = vcmp.ge.f32.partialorder %v484_v3, 15000.0  ;;  %vm85_vm5 = vcmp.ge.f32.partialorder %v486_v4, 15000.0  ;;  %v80_v12 = vsel %vm78_vm2, 9.0, %v403_v11  ;;  %v153_v13 = vadd.f32 %v107_v10, %v106_v8 }
  0x3c   :  { %vm511_vm7 = vmxor %vm84_vm4, %vm404_vm6  ;;  %vm86_vm8 = vcmp.ge.f32.partialorder %v484_v3, 20000.0  ;;  %vm87_vm9 = vcmp.ge.f32.partialorder %v486_v4, 20000.0  ;;  %v133_v16 = vadd.f32 %v69_v9, %v68_v7  ;;  %v81_v17 = vsel %vm79_vm3, 9.0, %v403_v11  ;;  %p376_p13 = por %p375_p12, %p374_p11 }
  0x3d   :  { %vm522_vm10 = vmxor %vm85_vm5, %vm404_vm6  ;;  %v110_v19 = vsel %vm511_vm7, 1.0, %v402_v0  ;;  %vm88_vm11 = vcmp.ge.f32.partialorder %v484_v3, 40000.0  ;;  %v154_v21 = vrot.slane %v153_v13, 4  ;;  %vm89_vm13 = vcmp.ge.f32.partialorder %v486_v4, 40000.0 }
  0x3e   :  { %v111_v22 = vsel %vm522_vm10, 1.0, %v402_v0  ;;  %vm92_vm12 = vmxor %vm86_vm8, %vm404_vm6  ;;  %v540_v23 = vmul.f32 0.95, %v484_v3  ;;  %v134_v24 = vrot.slane %v133_v16, 4  ;;  %v546_v26 = vmul.f32 0.95, %v486_v4  ;;  %p377_p0 = pnand %p376_p13, %p370_p10 }
  0x3f   :  { %v173_v25 = vadd.f32 %v111_v22, %v110_v19  ;;  %vm93_vm14 = vmxor %vm87_vm9, %vm404_vm6  ;;  %vm126_vm15 = vcmp.gt.f32.partialorder %v517_v15, 800.0  ;;  %v155_v27 = vadd.f32 %v154_v21, %v153_v13  ;;  %vm127_vm1 = vcmp.gt.f32.partialorder %v530_v20, 800.0  ;;  %v152_v60 = vld [vmem:[#allocation8 + $0x2] sm:$0x1]  ;;  %v132_v63 = vld [vmem:[#allocation8] sm:$0x1] }
  0x40   :  { %vm551_vm2 = vmand %vm84_vm4, %vm92_vm12  ;;  %vm102_vm3 = vcmp.lt.f32.partialorder %v480_v1, %v540_v23  ;;  %v561_v29 = vsel %vm126_vm15, 1.0, %v402_v0  ;;  %v135_v30 = vadd.f32 %v134_v24, %v133_v16  ;;  %vm103_vm4 = vcmp.lt.f32.partialorder %v482_v2, %v546_v26  ;;  %v172_v14 = vld [vmem:[#allocation8 + $0x4] sm:$0x1]  ;;  %v192_v46 = vld [vmem:[#allocation8 + $0x6] sm:$0x1] }
  0x41   :  { %v174_v31 = vrot.slane %v173_v25, 4  ;;  %vm565_vm0 = vmand %vm85_vm5, %vm93_vm14  ;;  %v114_v33 = vsel %vm551_vm2, 1.0, %v402_v0  ;;  %v156_v35 = vrot.slane %v155_v27, 2  ;;  %v122_v37 = vsel %vm102_vm3, 1.0, %v402_v0 }
  0x42   :  { %v300_v34 = vpop.eup %299  ;;  %v115_v36 = vsel %vm565_vm0, 1.0, %v402_v0  ;;  %vm96_vm5 = vmxor %vm88_vm11, %vm404_vm6  ;;  %v123_v38 = vsel %vm103_vm4, 1.0, %v402_v0  ;;  %v136_v41 = vrot.slane %v135_v30, 2  ;;  %v602_v48 = vsel %vm127_vm1, 1.0, %v402_v0 }
  0x43   :  { %v302_v39 = vpop.eup %301  ;;  %v72_v40 = vmul.f32 %v300_v34, %v300_v34  ;;  %v175_v42 = vadd.f32 %v174_v31, %v173_v25  ;;  %v193_v43 = vadd.f32 %v115_v36, %v114_v33  ;;  %vm97_vm12 = vmxor %vm89_vm13, %vm404_vm6  ;;  %v157_v45 = vadd.f32 %v156_v35, %v155_v27 }
  0x44   :  { %v73_v44 = vmul.f32 %v302_v39, %v302_v39  ;;  %vm593_vm11 = vmand %vm86_vm8, %vm96_vm5  ;;  %v597_v47 = vadd.f32 %v123_v38, %v122_v37  ;;  %v137_v50 = vadd.f32 %v136_v41, %v135_v30  ;;  %vm697_vm8 = vcmp.gt.f32.partialorder %v484_v3, 35.0 }
  0x45   :  { %v604_v49 = vmul.f32 %v72_v40, %v68_v7  ;;  %v176_v51 = vrot.slane %v175_v42, 2  ;;  %v194_v52 = vrot.slane %v193_v43, 4  ;;  %vm608_vm6 = vmand %vm87_vm9, %vm97_vm12  ;;  %v158_v55 = vrot.slane %v157_v45, 1 }
  0x46   :  { %v612_v54 = vmul.f32 %v73_v44, %v69_v9  ;;  %v118_v56 = vsel %vm593_vm11, 1.0, %v402_v0  ;;  %v119_v57 = vsel %vm608_vm6, 1.0, %v402_v0  ;;  %v138_v58 = vrot.slane %v137_v50, 1 }
  0x47   :  { %v82_v59 = vmul.f32 %v80_v12, %v604_v49  ;;  %v108_v61 = vsel %vm511_vm7, %v604_v49, 0.0  ;;  %v177_v62 = vadd.f32 %v176_v51, %v175_v42  ;;  %v159_v6 = vadd.f32 %v158_v55, %v157_v45 }
  0x48   :  { %v83_v5 = vmul.f32 %v81_v17, %v612_v54  ;;  %v109_v7 = vsel %vm522_vm10, %v612_v54, 0.0  ;;  %v112_v0 = vsel %vm551_vm2, %v604_v49, 0.0  ;;  %v139_v8 = vadd.f32 %v138_v58, %v137_v50 }
  0x49   :  { %v104_v9 = vsel %vm697_vm8, %v82_v59, 0.0  ;;  %v163_v10 = vadd.f32 %v109_v7, %v108_v61  ;;  %v178_v11 = vrot.slane %v177_v62, 1  ;;  %vm698_vm7 = vcmp.gt.f32.partialorder %v486_v4, 35.0  ;;  %v162_v59 = vld [vmem:[#allocation8 + $0x3] sm:$0x1] }
  0x4a   :  { %v105_v12 = vsel %vm698_vm7, %v83_v5, 0.0  ;;  %v160_v13 = vadd.f32 %v159_v6, %v152_v60  ;;  %v113_v16 = vsel %vm565_vm0, %v612_v54, 0.0  ;;  %v195_v17 = vadd.f32 %v194_v52, %v193_v43 }
  0x4b   :  { %v140_v18 = vadd.f32 %v139_v8, %v132_v63  ;;  %v143_v19 = vadd.f32 %v105_v12, %v104_v9  ;;  %v164_v21 = vrot.slane %v163_v10, 4  ;;  %v179_v22 = vadd.f32 %v178_v11, %v177_v62  ;;  %v142_v8 = vld [vmem:[#allocation8 + $0x1] sm:$0x1] }
  0x4c   :  { %161 = vst [vmem:[#allocation8 + $0x2] sm:$0x1] %v160_v13  ;;  %v183_v24 = vadd.f32 %v113_v16, %v112_v0  ;;  %v196_v3 = vrot.slane %v195_v17, 2  ;;  %v116_v25 = vsel %vm593_vm11, %v604_v49, 0.0  ;;  %v117_v4 = vsel %vm608_vm6, %v612_v54, 0.0 }
  0x4d   :  { %141 = vst [vmem:[#allocation8] sm:$0x1] %v140_v18  ;;  %v144_v27 = vrot.slane %v143_v19, 4  ;;  %v165_v28 = vadd.f32 %v164_v21, %v163_v10  ;;  %v180_v30 = vadd.f32 %v179_v22, %v172_v14  ;;  %v203_v31 = vadd.f32 %v117_v4, %v116_v25  ;;  %v182_v13 = vld [vmem:[#allocation8 + $0x5] sm:$0x1] }
  0x4e   :  { %v184_v32 = vrot.slane %v183_v24, 4  ;;  %v197_v33 = vadd.f32 %v196_v3, %v195_v17  ;;  %v213_v34 = vadd.f32 %v119_v57, %v118_v56  ;;  %v223_v35 = vadd.f32 %v612_v54, %v604_v49  ;;  %v202_v18 = vld [vmem:[#allocation8 + $0x7] sm:$0x1]  ;;  %v212_v25 = vld [vmem:[#allocation8 + $0x8] sm:$0x1] }
  0x4f   :  { %v145_v36 = vadd.f32 %v144_v27, %v143_v19  ;;  %v166_v37 = vrot.slane %v165_v28, 2  ;;  %181 = vst [vmem:[#allocation8 + $0x4] sm:$0x1] %v180_v30  ;;  %v204_v38 = vrot.slane %v203_v31, 4  ;;  %v120_v39 = vsel %vm102_vm3, %v604_v49, 0.0 }
  0x50   :  { %v185_v40 = vadd.f32 %v184_v32, %v183_v24  ;;  %v198_v41 = vrot.slane %v197_v33, 1  ;;  %v214_v42 = vrot.slane %v213_v34, 4  ;;  %v224_v43 = vrot.slane %v223_v35, 4  ;;  %v222_v4 = vld [vmem:[#allocation8 + $0x9] sm:$0x1] }
  0x51   :  { %v146_v44 = vrot.slane %v145_v36, 2  ;;  %v167_v45 = vadd.f32 %v166_v37, %v165_v28  ;;  %v205_v50 = vadd.f32 %v204_v38, %v203_v31  ;;  %v121_v51 = vsel %vm103_vm4, %v612_v54, 0.0 }
  0x52   :  { %v186_v52 = vrot.slane %v185_v40, 2  ;;  %v199_v53 = vadd.f32 %v198_v41, %v197_v33  ;;  %v215_v55 = vadd.f32 %v214_v42, %v213_v34  ;;  %v225_v56 = vadd.f32 %v224_v43, %v223_v35  ;;  %v232_v41 = vld [vmem:[#allocation8 + $0xa] sm:$0x1] }
  0x53   :  { %v147_v57 = vadd.f32 %v146_v44, %v145_v36  ;;  %v168_v1 = vrot.slane %v167_v45, 1  ;;  %v206_v23 = vrot.slane %v205_v50, 2  ;;  %v233_v58 = vadd.f32 %v121_v51, %v120_v39 }
  0x54   :  { %v187_v60 = vadd.f32 %v186_v52, %v185_v40  ;;  %v200_v61 = vadd.f32 %v199_v53, %v192_v46  ;;  %v216_v62 = vrot.slane %v215_v55, 2  ;;  %v226_v63 = vrot.slane %v225_v56, 2 }
  0x55   :  { %v148_v5 = vrot.slane %v147_v57, 1  ;;  %v169_v6 = vadd.f32 %v168_v1, %v167_v45  ;;  %v207_v7 = vadd.f32 %v206_v23, %v205_v50  ;;  %v234_v0 = vrot.slane %v233_v58, 4  ;;  %v242_v45 = vld [vmem:[#allocation8 + $0xb] sm:$0x1]  ;;  %v252_v1 = vld [vmem:[#allocation8 + $0xc] sm:$0x1] }
  0x56   :  { %v188_v2 = vrot.slane %v187_v60, 1  ;;  %201 = vst [vmem:[#allocation8 + $0x6] sm:$0x1] %v200_v61  ;;  %v217_v26 = vadd.f32 %v216_v62, %v215_v55  ;;  %v227_v9 = vadd.f32 %v226_v63, %v225_v56  ;;  %v244_v10 = vrot.slane %v597_v47, 4 }
  0x57   :  { %v149_v11 = vadd.f32 %v148_v5, %v147_v57  ;;  %v170_v12 = vadd.f32 %v169_v6, %v162_v59  ;;  %v208_v14 = vrot.slane %v207_v7, 1  ;;  %v235_v16 = vadd.f32 %v234_v0, %v233_v58  ;;  %v262_v57 = vld [vmem:[#allocation8 + $0xd] sm:$0x1] }
  0x58   :  { %v189_v17 = vadd.f32 %v188_v2, %v187_v60  ;;  %v218_v19 = vrot.slane %v217_v26, 1  ;;  %v228_v21 = vrot.slane %v227_v9, 1  ;;  %v245_v22 = vadd.f32 %v244_v10, %v597_v47 }
  0x59   :  { %v150_v24 = vadd.f32 %v149_v11, %v142_v8  ;;  %171 = vst [vmem:[#allocation8 + $0x3] sm:$0x1] %v170_v12  ;;  %v209_v3 = vadd.f32 %v208_v14, %v207_v7  ;;  %v236_v27 = vrot.slane %v235_v16, 2  ;;  %v128_v28 = vsel %vm126_vm15, %v604_v49, 0.0 }
  0x5a   :  { %v190_v30 = vadd.f32 %v189_v17, %v182_v13  ;;  %v219_v31 = vadd.f32 %v218_v19, %v217_v26  ;;  %v229_v32 = vadd.f32 %v228_v21, %v227_v9  ;;  %v246_v33 = vrot.slane %v245_v22, 2 }
  0x5b   :  { %151 = vst [vmem:[#allocation8 + $0x1] sm:$0x1] %v150_v24  ;;  %v210_v34 = vadd.f32 %v209_v3, %v202_v18  ;;  %v237_v35 = vadd.f32 %v236_v27, %v235_v16  ;;  %v129_v47 = vsel %vm127_vm1, %v612_v54, 0.0  ;;  %v263_v36 = vadd.f32 %v602_v48, %v561_v29 }
  0x5c   :  { %191 = vst [vmem:[#allocation8 + $0x5] sm:$0x1] %v190_v30  ;;  %v220_v37 = vadd.f32 %v219_v31, %v212_v25  ;;  %v230_v38 = vadd.f32 %v229_v32, %v222_v4  ;;  %v247_v39 = vadd.f32 %v246_v33, %v245_v22  ;;  %v253_v15 = vadd.f32 %v129_v47, %v128_v28 }
  0x5d   :  { %211 = vst [vmem:[#allocation8 + $0x7] sm:$0x1] %v210_v34  ;;  %v238_v49 = vrot.slane %v237_v35, 1  ;;  %v264_v40 = vrot.slane %v263_v36, 4 }
  0x5e   :  { %221 = vst [vmem:[#allocation8 + $0x8] sm:$0x1] %v220_v37  ;;  %231 = vst [vmem:[#allocation8 + $0x9] sm:$0x1] %v230_v38  ;;  %v248_v42 = vrot.slane %v247_v39, 1  ;;  %v254_v43 = vrot.slane %v253_v15, 4 }
  0x5f   :  { %v239_v44 = vadd.f32 %v238_v49, %v237_v35  ;;  %v265_v20 = vadd.f32 %v264_v40, %v263_v36 }
  0x60   :  { %v249_v54 = vadd.f32 %v248_v42, %v247_v39  ;;  %v255_v46 = vadd.f32 %v254_v43, %v253_v15 }
  0x61   :  { %v240_v50 = vadd.f32 %v239_v44, %v232_v41  ;;  %v266_v29 = vrot.slane %v265_v20, 2 }
  0x62   :  { %v250_v48 = vadd.f32 %v249_v54, %v242_v45  ;;  %v256_v51 = vrot.slane %v255_v46, 2 }
  0x63   :  { %241 = vst [vmem:[#allocation8 + $0xa] sm:$0x1] %v240_v50  ;;  %v267_v52 = vadd.f32 %v266_v29, %v265_v20 }
  0x64   :  { %251 = vst [vmem:[#allocation8 + $0xb] sm:$0x1] %v250_v48  ;;  %v257_v53 = vadd.f32 %v256_v51, %v255_v46 }
  0x65   :  { %v268_v55 = vrot.slane %v267_v52, 1 }
  0x66   :  { %v258_v56 = vrot.slane %v257_v53, 1 }
  0x67   :  { %v269_v23 = vadd.f32 %v268_v55, %v267_v52 }
  0x68   :  { %v259_v58 = vadd.f32 %v258_v56, %v257_v53 }
  0x69   :  { %v270_v59 = vadd.f32 %v269_v23, %v262_v57 }
  0x6a   :  { %v260_v60 = vadd.f32 %v259_v58, %v252_v1 }
  0x6b   :  { %271 = vst [vmem:[#allocation8 + $0xd] sm:$0x1] %v270_v59 }
  0x6c   :  { %261 = vst [vmem:[#allocation8 + $0xc] sm:$0x1] %v260_v60 }
  0x6d   :  { %380 = shalt.err (!%p377_p0)
}
  0x6e   :  { %s381_s27 = scalar_lea.hbm %s682_s3, 256 }
  0x6f   :  { %p382_p1 = scmp.ne.s32.totalorder %s682_s3, %s381_s27  ;;  %p385_p2 = scmp.lt.u32.totalorder %s381_s27, %s682_s3 }
  0x71   :  { %p387_p3 = pnand %p385_p2, %p382_p1 }
  0x73   :  { %390 = shalt.err (!%p387_p3)
}
  0x74   :  { %283 = dma.vmem_to_hbm [thread:$0]  %s278_s21, 256, %s682_s3, [#allocation4], %s399_s24, %s399_s24, %s400_s25  }
  0x75   :  { %395 = dma.done.wait [#allocation4], 256  }
  0x76   :  { %396 = vsyncadd [#allocation4], 4294967040 }
  0x77   :  { %287 = vsyncpa [#allocation3], 1 }
  0x78   :  { %288 = vsyncpa [#allocation6], 1 }
  0x79   :  { %289 = vsyncpa [#allocation4], 1 }

</bundles_post_ra>
